<compile_context>
chip_gen: v7x
topology: tpu7x:2x2x1
jax: 0.10.0
libtpu: 0.0.40
codegen_flags: <defaults>
</compile_context>

<pallas_src>
import jax
import jax.numpy as jnp
from jax import lax
from jax.experimental import pallas as pl
from jax.experimental.pallas import tpu as pltpu


def _attention_kernel(dec_ref, enc_ref, mask_ref,
                      wq_ref, bq_ref, wk_ref, bk_ref, wv_ref, bv_ref,
                      out_ref, k_scr, v_scr):
    d = dec_ref.shape[-1]

    # ---- K/V projection: once per batch.  The query-tile grid axis (axis 1)
    # is innermost and "arbitrary", so the scratch written here is valid for
    # every query tile of this batch element.
    @pl.when(pl.program_id(1) == 0)
    def _():
        enc = enc_ref[...]                                    # (S_enc, D) bf16
        k = jnp.dot(enc, wk_ref[...],
                    preferred_element_type=jnp.float32) + bk_ref[...]
        v = jnp.dot(enc, wv_ref[...],
                    preferred_element_type=jnp.float32) + bv_ref[...]
        k_scr[...] = k.astype(jnp.bfloat16)
        v_scr[...] = v.astype(jnp.bfloat16)

    # ---- Q projection for this query tile (bf16 x bf16 -> f32 on the MXU).
    dec = dec_ref[...]                                        # (tq, D) bf16
    q = jnp.dot(dec, wq_ref[...],
                preferred_element_type=jnp.float32) + bq_ref[...]

    # Fold the 1/sqrt(D) softmax scale into q (cheap (tq, D) multiply).
    inv_scale = jnp.float32(1.0 / (float(d) ** 0.5))
    q_s = (q * inv_scale).astype(jnp.bfloat16)

    # logits = (q / sqrt(D)) @ K^T without materializing K^T: contract dim 1.
    logits = lax.dot_general(
        q_s, k_scr[...],
        dimension_numbers=(((1,), (1,)), ((), ())),
        preferred_element_type=jnp.float32)                   # (tq, S_enc) f32

    # masked_fill(mask, -inf): compare the int8 mask directly (no f32 unpack).
    # Large finite negative so exp underflows to exactly 0 for masked keys.
    logits = jnp.where(mask_ref[...] != 0, jnp.float32(-1e30), logits)

    # Numerically stable softmax with DEFERRED normalization: normalize the
    # (tq, D) PV product instead of the (tq, S_enc) probabilities.
    m = jnp.max(logits, axis=-1, keepdims=True)
    e = jnp.exp(logits - m)
    denom = jnp.sum(e, axis=-1, keepdims=True)

    pv = jnp.dot(e.astype(jnp.bfloat16), v_scr[...],
                 preferred_element_type=jnp.float32)          # (tq, D) f32
    out_ref[...] = (pv * pl.reciprocal(denom, approx=True)).astype(out_ref.dtype)


# ----------------------------------------------------------------------------
# Generation-aware tiling helpers (pure Python, evaluated at trace time).
# ----------------------------------------------------------------------------
def _tpu_generation() -> str:
    try:
        kind = jax.devices()[0].device_kind.lower()
    except Exception:
        return ""
    for g in ("v7", "v6", "v5"):
        if g in kind:
            return g
    return ""


def _vmem_budget_bytes(gen: str) -> int:
    if gen == "v7":
        return 48 * 1024 * 1024      # 64 MiB physical per TC -> leave headroom
    return 96 * 1024 * 1024          # v5e / v6e: 128 MiB physical


def _tq_cap(gen: str) -> int:
    if gen == "v6":
        return 512                   # fill the 256-wide MXU, amortize grid overhead
    return 128                       # v5e: BW/store bound; v7x: small VMEM


def _vmem_estimate_bytes(tq: int, s_enc: int, d: int) -> int:
    bf, f32 = 2, 4
    dec = 2 * tq * d * bf                  # decoder tile (double buffered)
    enc = 2 * s_enc * d * bf               # encoder block (double buffered)
    msk = 2 * tq * s_enc                   # int8 mask tile (double buffered)
    out = 2 * tq * d * f32                 # output tile (double buffered)
    wts = 2 * 3 * (d * d + d) * bf         # Wq/Wk/Wv + biases (double buffered)
    scr = 2 * s_enc * d * bf               # K/V bf16 scratch
    tmp = 3 * tq * s_enc * f32             # logits / exp / select live temporaries
    return dec + enc + msk + out + wts + scr + tmp


def _pick_tq(s_dec: int, s_enc: int, d: int, cap: int, budget: int) -> int:
    for cand in (512, 256, 128, 64, 32, 16, 8):
        if (cand <= cap and s_dec % cand == 0
                and _vmem_estimate_bytes(cand, s_enc, d) <= budget):
            return cand
    return s_dec                           # tiny / odd lengths: one query tile


@jax.jit
def attention_layer(encoder_seq, decoder_seq, mask,
                    wq_t, bq, wk_t, bk, wv_t, bv):
    """encoder_seq: (B, S_enc, D); decoder_seq: (B, S_dec, D);
       mask: (B, S_dec, S_enc), nonzero => masked;
       w*_t: (D, D) pre-transposed linear weights; b*: (1, D) biases.
       Returns (B, S_dec, D) in decoder_seq.dtype."""
    B, S_enc, D = encoder_seq.shape
    _, S_dec, _ = decoder_seq.shape

    gen = _tpu_generation()
    budget = _vmem_budget_bytes(gen)
    tq = _pick_tq(S_dec, S_enc, D, _tq_cap(gen), budget)
    n_q = S_dec // tq

    # Cast the HBM streams that feed the MXU to bf16; keep biases f32.
    dec_bf = decoder_seq.astype(jnp.bfloat16)
    enc_bf = encoder_seq.astype(jnp.bfloat16)
    # (mask != 0) preserves torch masked_fill semantics for fractional /
    # negative mask values before the int8 narrowing.
    mask_i8 = (mask != 0).astype(jnp.int8)
    wq_bf = wq_t.astype(jnp.bfloat16)
    wk_bf = wk_t.astype(jnp.bfloat16)
    wv_bf = wv_t.astype(jnp.bfloat16)
    bq_f = bq.astype(jnp.float32)
    bk_f = bk.astype(jnp.float32)
    bv_f = bv.astype(jnp.float32)

    grid_spec = pltpu.PrefetchScalarGridSpec(
        num_scalar_prefetch=0,
        grid=(B, n_q),
        in_specs=[
            # decoder queries: one (tq, D) tile per grid step
            pl.BlockSpec((pl.Squeezed(), tq, D), lambda b, i: (b, i, 0)),
            # encoder: full sequence, re-fetched only when the batch changes
            pl.BlockSpec((pl.Squeezed(), S_enc, D), lambda b, i: (b, 0, 0)),
            # mask tile for this query block (int8 stream)
            pl.BlockSpec((pl.Squeezed(), tq, S_enc), lambda b, i: (b, i, 0)),
            # projection weights / biases (grid-invariant, stay resident)
            pl.BlockSpec((D, D), lambda b, i: (0, 0)),   # Wq^T
            pl.BlockSpec((1, D), lambda b, i: (0, 0)),   # bq
            pl.BlockSpec((D, D), lambda b, i: (0, 0)),   # Wk^T
            pl.BlockSpec((1, D), lambda b, i: (0, 0)),   # bk
            pl.BlockSpec((D, D), lambda b, i: (0, 0)),   # Wv^T
            pl.BlockSpec((1, D), lambda b, i: (0, 0)),   # bv
        ],
        out_specs=pl.BlockSpec((pl.Squeezed(), tq, D), lambda b, i: (b, i, 0)),
        scratch_shapes=[
            pltpu.VMEM((S_enc, D), jnp.bfloat16),        # K (projected, bf16)
            pltpu.VMEM((S_enc, D), jnp.bfloat16),        # V (projected, bf16)
        ],
    )

    # Query axis must be "arbitrary": the K/V scratch written at i == 0 is
    # carried across it.  Batch stays "parallel" (megacore sharding on v7x);
    # note that for B == 1 on v7x half the chip idles — acceptable trade-off
    # for eliminating the per-tile K/V recompute.
    return pl.pallas_call(
        _attention_kernel,
        out_shape=jax.ShapeDtypeStruct((B, S_dec, D), decoder_seq.dtype),
        grid_spec=grid_spec,
        compiler_params=pltpu.CompilerParams(
            dimension_semantics=("parallel", "arbitrary"),
            vmem_limit_bytes=budget),
    )(dec_bf, enc_bf, mask_i8, wq_bf, bq_f, wk_bf, bk_f, wv_bf, bv_f)


def _reference(encoder_seq, decoder_seq, mask, wq_t, bq, wk_t, bk, wv_t, bv):
    q = decoder_seq @ wq_t + bq
    k = encoder_seq @ wk_t + bk
    v = encoder_seq @ wv_t + bv
    sim = jnp.einsum("bqd,bkd->bqk", q, k)
    sim = jnp.where(mask != 0, -jnp.inf, sim)
    p = jax.nn.softmax(sim / jnp.sqrt(jnp.float32(q.shape[-1])), axis=-1)
    return jnp.einsum("bqk,bkd->bqd", p, v)


if __name__ == "__main__":
    key = jax.random.PRNGKey(0)
    B, S_enc, S_dec, D = 2, 8, 8, 32

    ks = jax.random.split(key, 9)
    encoder_seq = jax.random.normal(ks[0], (B, S_enc, D), dtype=jnp.float32)
    decoder_seq = jax.random.normal(ks[1], (B, S_dec, D), dtype=jnp.float32)

    # nn.Linear-style init (weight (D, D), bias (D,)), stored pre-transposed
    # to (in, out) and bias reshaped to (1, D).
    bound = 1.0 / (D ** 0.5)
    wq_t = jax.random.uniform(ks[2], (D, D), minval=-bound, maxval=bound, dtype=jnp.float32)
    wk_t = jax.random.uniform(ks[3], (D, D), minval=-bound, maxval=bound, dtype=jnp.float32)
    wv_t = jax.random.uniform(ks[4], (D, D), minval=-bound, maxval=bound, dtype=jnp.float32)
    bq = jax.random.uniform(ks[5], (1, D), minval=-bound, maxval=bound, dtype=jnp.float32)
    bk = jax.random.uniform(ks[6], (1, D), minval=-bound, maxval=bound, dtype=jnp.float32)
    bv = jax.random.uniform(ks[7], (1, D), minval=-bound, maxval=bound, dtype=jnp.float32)

    # Padding-style mask: last two encoder positions of batch 1 are masked
    # (nonzero == masked, matching torch's masked_fill semantics).
    mask = jnp.zeros((B, S_dec, S_enc), dtype=jnp.float32)
    mask = mask.at[1, :, S_enc - 2:].set(1.0)

    out = attention_layer(encoder_seq, decoder_seq, mask,
                          wq_t, bq, wk_t, bk, wv_t, bv)
    out = jax.block_until_ready(out)

    ref = _reference(encoder_seq, decoder_seq, mask, wq_t, bq, wk_t, bk, wv_t, bv)
    assert out.shape == (B, S_dec, D)
    # Tolerance widened vs. pure f32: matmul inputs are bf16 and the softmax
    # reciprocal uses the approximate EUP path.
    assert jnp.allclose(out, ref, atol=2e-2, rtol=2e-2), "mismatch vs reference"

    print("KERNEL_OK")
</pallas_src>

<mosaic_0001>
module attributes {stable_mosaic.version = 11 : i64} {
  func.func @_attention_kernel(%arg0: i32, %arg1: i32, %arg2: memref<1x8x32xbf16, #tpu.memory_space<vmem>>, %arg3: memref<1x8x32xbf16, #tpu.memory_space<vmem>>, %arg4: memref<1x8x8xi8, #tpu.memory_space<vmem>>, %arg5: memref<32x32xbf16, #tpu.memory_space<vmem>>, %arg6: memref<1x32xf32, #tpu.memory_space<vmem>>, %arg7: memref<32x32xbf16, #tpu.memory_space<vmem>>, %arg8: memref<1x32xf32, #tpu.memory_space<vmem>>, %arg9: memref<32x32xbf16, #tpu.memory_space<vmem>>, %arg10: memref<1x32xf32, #tpu.memory_space<vmem>>, %arg11: memref<1x8x32xf32, #tpu.memory_space<vmem>>, %arg12: memref<8x32xbf16, #tpu.memory_space<vmem>>, %arg13: memref<8x32xbf16, #tpu.memory_space<vmem>>) attributes {dimension_semantics = [#tpu.dimension_semantics<parallel>, #tpu.dimension_semantics<arbitrary>], iteration_bounds = array<i64: 2, 1>, scalar_prefetch = 0 : i64, scratch_operands = 2 : i64, tpu.core_type = #tpu.core_type<tc>, window_params = [{transform_indices = @transform_0, window_bounds = array<i64: 1, 8, 32>}, {transform_indices = @transform_1, window_bounds = array<i64: 1, 8, 32>}, {transform_indices = @transform_2, window_bounds = array<i64: 1, 8, 8>}, {pipeline_mode = #tpu.pipeline_mode<synchronous>, transform_indices = @transform_3, window_bounds = array<i64: 32, 32>}, {pipeline_mode = #tpu.pipeline_mode<synchronous>, transform_indices = @transform_4, window_bounds = array<i64: 1, 32>}, {pipeline_mode = #tpu.pipeline_mode<synchronous>, transform_indices = @transform_5, window_bounds = array<i64: 32, 32>}, {pipeline_mode = #tpu.pipeline_mode<synchronous>, transform_indices = @transform_6, window_bounds = array<i64: 1, 32>}, {pipeline_mode = #tpu.pipeline_mode<synchronous>, transform_indices = @transform_7, window_bounds = array<i64: 32, 32>}, {pipeline_mode = #tpu.pipeline_mode<synchronous>, transform_indices = @transform_8, window_bounds = array<i64: 1, 32>}, {transform_indices = @transform_9, window_bounds = array<i64: 1, 8, 32>}]} {
    %c0_i32 = arith.constant 0 : i32
    %0 = arith.cmpi eq, %arg1, %c0_i32 : i32
    %1 = arith.extui %0 : i1 to i32
    %c0_i32_0 = arith.constant 0 : i32
    %2 = arith.cmpi ne, %1, %c0_i32_0 : i32
    scf.if %2 {
      %c0_23 = arith.constant 0 : index
      %c0_24 = arith.constant 0 : index
      %c0_25 = arith.constant 0 : index
      %37 = vector.load %arg3[%c0_23, %c0_24, %c0_25] : memref<1x8x32xbf16, #tpu.memory_space<vmem>>, vector<1x8x32xbf16>
      %38 = vector.shape_cast %37 : vector<1x8x32xbf16> to vector<8x32xbf16>
      %c0_26 = arith.constant 0 : index
      %c0_27 = arith.constant 0 : index
      %39 = vector.load %arg7[%c0_26, %c0_27] : memref<32x32xbf16, #tpu.memory_space<vmem>>, vector<32x32xbf16>
      %cst_28 = arith.constant dense<0.000000e+00> : vector<8x32xf32>
      %40 = tpu.matmul %38, %39, %cst_28 {dimension_numbers = #tpu.dot_dimension_numbers<[1], [0], [0], [1], [0, 0, 1, 1], [], []>} : vector<8x32xbf16>, vector<32x32xbf16>, vector<8x32xf32> -> vector<8x32xf32>
      %c0_29 = arith.constant 0 : index
      %c0_30 = arith.constant 0 : index
      %41 = vector.load %arg8[%c0_29, %c0_30] : memref<1x32xf32, #tpu.memory_space<vmem>>, vector<1x32xf32>
      %42 = vector.broadcast %41 : vector<1x32xf32> to vector<8x32xf32>
      %43 = arith.addf %40, %42 : vector<8x32xf32>
      %c0_31 = arith.constant 0 : index
      %c0_32 = arith.constant 0 : index
      %44 = vector.load %arg9[%c0_31, %c0_32] : memref<32x32xbf16, #tpu.memory_space<vmem>>, vector<32x32xbf16>
      %cst_33 = arith.constant dense<0.000000e+00> : vector<8x32xf32>
      %45 = tpu.matmul %38, %44, %cst_33 {dimension_numbers = #tpu.dot_dimension_numbers<[1], [0], [0], [1], [0, 0, 1, 1], [], []>} : vector<8x32xbf16>, vector<32x32xbf16>, vector<8x32xf32> -> vector<8x32xf32>
      %c0_34 = arith.constant 0 : index
      %c0_35 = arith.constant 0 : index
      %46 = vector.load %arg10[%c0_34, %c0_35] : memref<1x32xf32, #tpu.memory_space<vmem>>, vector<1x32xf32>
      %47 = vector.broadcast %46 : vector<1x32xf32> to vector<8x32xf32>
      %48 = arith.addf %45, %47 : vector<8x32xf32>
      %49 = arith.truncf %43 : vector<8x32xf32> to vector<8x32xbf16>
      %c0_36 = arith.constant 0 : index
      %c0_37 = arith.constant 0 : index
      %50 = vector.load %arg12[%c0_36, %c0_37] : memref<8x32xbf16, #tpu.memory_space<vmem>>, vector<8x32xbf16>
      tpu.vector_store %arg12[%c0_36, %c0_37], %49 {strides = array<i32>} : memref<8x32xbf16, #tpu.memory_space<vmem>>, vector<8x32xbf16>,
      %51 = arith.truncf %48 : vector<8x32xf32> to vector<8x32xbf16>
      %c0_38 = arith.constant 0 : index
      %c0_39 = arith.constant 0 : index
      %52 = vector.load %arg13[%c0_38, %c0_39] : memref<8x32xbf16, #tpu.memory_space<vmem>>, vector<8x32xbf16>
      tpu.vector_store %arg13[%c0_38, %c0_39], %51 {strides = array<i32>} : memref<8x32xbf16, #tpu.memory_space<vmem>>, vector<8x32xbf16>,
    } else {
    }
    %c0 = arith.constant 0 : index
    %c0_1 = arith.constant 0 : index
    %c0_2 = arith.constant 0 : index
    %3 = vector.load %arg2[%c0, %c0_1, %c0_2] : memref<1x8x32xbf16, #tpu.memory_space<vmem>>, vector<1x8x32xbf16>
    %4 = vector.shape_cast %3 : vector<1x8x32xbf16> to vector<8x32xbf16>
    %c0_3 = arith.constant 0 : index
    %c0_4 = arith.constant 0 : index
    %5 = vector.load %arg5[%c0_3, %c0_4] : memref<32x32xbf16, #tpu.memory_space<vmem>>, vector<32x32xbf16>
    %cst = arith.constant dense<0.000000e+00> : vector<8x32xf32>
    %6 = tpu.matmul %4, %5, %cst {dimension_numbers = #tpu.dot_dimension_numbers<[1], [0], [0], [1], [0, 0, 1, 1], [], []>} : vector<8x32xbf16>, vector<32x32xbf16>, vector<8x32xf32> -> vector<8x32xf32>
    %c0_5 = arith.constant 0 : index
    %c0_6 = arith.constant 0 : index
    %7 = vector.load %arg6[%c0_5, %c0_6] : memref<1x32xf32, #tpu.memory_space<vmem>>, vector<1x32xf32>
    %8 = vector.broadcast %7 : vector<1x32xf32> to vector<8x32xf32>
    %9 = arith.addf %6, %8 : vector<8x32xf32>
    %cst_7 = arith.constant 0.176776692 : f32
    %10 = vector.broadcast %cst_7 : f32 to vector<8x32xf32>
    %11 = arith.mulf %9, %10 : vector<8x32xf32>
    %12 = arith.truncf %11 : vector<8x32xf32> to vector<8x32xbf16>
    %c0_8 = arith.constant 0 : index
    %c0_9 = arith.constant 0 : index
    %13 = vector.load %arg12[%c0_8, %c0_9] : memref<8x32xbf16, #tpu.memory_space<vmem>>, vector<8x32xbf16>
    %cst_10 = arith.constant dense<0.000000e+00> : vector<8x8xf32>
    %14 = tpu.matmul %12, %13, %cst_10 {dimension_numbers = #tpu.dot_dimension_numbers<[1], [1], [0], [0], [0, 0, 1, 0], [], []>} : vector<8x32xbf16>, vector<8x32xbf16>, vector<8x8xf32> -> vector<8x8xf32>
    %c0_11 = arith.constant 0 : index
    %c0_12 = arith.constant 0 : index
    %c0_13 = arith.constant 0 : index
    %15 = vector.load %arg4[%c0_11, %c0_12, %c0_13] : memref<1x8x8xi8, #tpu.memory_space<vmem>>, vector<1x8x8xi8>
    %16 = vector.shape_cast %15 : vector<1x8x8xi8> to vector<8x8xi8>
    %c0_i8 = arith.constant 0 : i8
    %17 = vector.broadcast %c0_i8 : i8 to vector<8x8xi8>
    %18 = arith.cmpi ne, %16, %17 : vector<8x8xi8>
    %cst_14 = arith.constant -1.000000e+30 : f32
    %19 = vector.broadcast %cst_14 : f32 to vector<8x8xf32>
    %20 = arith.select %18, %19, %14 : vector<8x8xi1>, vector<8x8xf32>
    %cst_15 = arith.constant dense<0xFF800000> : vector<8xf32>
    %21 = vector.multi_reduction <maximumf>, %20, %cst_15 [1] : vector<8x8xf32> to vector<8xf32>
    %22 = vector.shape_cast %21 : vector<8xf32> to vector<8x1xf32>
    %23 = vector.broadcast %22 : vector<8x1xf32> to vector<8x8xf32>
    %24 = arith.subf %20, %23 : vector<8x8xf32>
    %25 = math.exp %24 : vector<8x8xf32>
    %cst_16 = arith.constant dense<0.000000e+00> : vector<8xf32>
    %26 = vector.multi_reduction <add>, %25, %cst_16 [1] : vector<8x8xf32> to vector<8xf32>
    %27 = vector.shape_cast %26 : vector<8xf32> to vector<8x1xf32>
    %28 = arith.truncf %25 : vector<8x8xf32> to vector<8x8xbf16>
    %c0_17 = arith.constant 0 : index
    %c0_18 = arith.constant 0 : index
    %29 = vector.load %arg13[%c0_17, %c0_18] : memref<8x32xbf16, #tpu.memory_space<vmem>>, vector<8x32xbf16>
    %cst_19 = arith.constant dense<0.000000e+00> : vector<8x32xf32>
    %30 = tpu.matmul %28, %29, %cst_19 {dimension_numbers = #tpu.dot_dimension_numbers<[1], [0], [0], [1], [0, 0, 1, 1], [], []>} : vector<8x8xbf16>, vector<8x32xbf16>, vector<8x32xf32> -> vector<8x32xf32>
    %31 = tpu.reciprocal %27 {approx = true} : vector<8x1xf32> -> vector<8x1xf32>
    %32 = vector.broadcast %31 : vector<8x1xf32> to vector<8x32xf32>
    %33 = arith.mulf %30, %32 : vector<8x32xf32>
    %c0_20 = arith.constant 0 : index
    %c0_21 = arith.constant 0 : index
    %c0_22 = arith.constant 0 : index
    %34 = vector.load %arg11[%c0_20, %c0_21, %c0_22] : memref<1x8x32xf32, #tpu.memory_space<vmem>>, vector<1x8x32xf32>
    %35 = vector.shape_cast %34 : vector<1x8x32xf32> to vector<8x32xf32>
    %36 = vector.shape_cast %33 : vector<8x32xf32> to vector<1x8x32xf32>
    tpu.vector_store %arg11[%c0_20, %c0_21, %c0_22], %36 {strides = array<i32>} : memref<1x8x32xf32, #tpu.memory_space<vmem>>, vector<1x8x32xf32>,
    return
  }
  func.func @transform_0(%arg0: i32, %arg1: i32) -> (i32, i32, i32) {
    %c0_i32 = arith.constant 0 : i32
    %c0_i32_0 = arith.constant 0 : i32
    return %arg0, %arg1, %c0_i32 : i32, i32, i32
  }
  func.func @transform_1(%arg0: i32, %arg1: i32) -> (i32, i32, i32) {
    %c0_i32 = arith.constant 0 : i32
    %c0_i32_0 = arith.constant 0 : i32
    %c0_i32_1 = arith.constant 0 : i32
    return %arg0, %c0_i32, %c0_i32_0 : i32, i32, i32
  }
  func.func @transform_2(%arg0: i32, %arg1: i32) -> (i32, i32, i32) {
    %c0_i32 = arith.constant 0 : i32
    %c0_i32_0 = arith.constant 0 : i32
    return %arg0, %arg1, %c0_i32 : i32, i32, i32
  }
  func.func @transform_3(%arg0: i32, %arg1: i32) -> (i32, i32) {
    %c0_i32 = arith.constant 0 : i32
    %c0_i32_0 = arith.constant 0 : i32
    %c0_i32_1 = arith.constant 0 : i32
    return %c0_i32, %c0_i32_0 : i32, i32
  }
  func.func @transform_4(%arg0: i32, %arg1: i32) -> (i32, i32) {
    %c0_i32 = arith.constant 0 : i32
    %c0_i32_0 = arith.constant 0 : i32
    %c0_i32_1 = arith.constant 0 : i32
    return %c0_i32, %c0_i32_0 : i32, i32
  }
  func.func @transform_5(%arg0: i32, %arg1: i32) -> (i32, i32) {
    %c0_i32 = arith.constant 0 : i32
    %c0_i32_0 = arith.constant 0 : i32
    %c0_i32_1 = arith.constant 0 : i32
    return %c0_i32, %c0_i32_0 : i32, i32
  }
  func.func @transform_6(%arg0: i32, %arg1: i32) -> (i32, i32) {
    %c0_i32 = arith.constant 0 : i32
    %c0_i32_0 = arith.constant 0 : i32
    %c0_i32_1 = arith.constant 0 : i32
    return %c0_i32, %c0_i32_0 : i32, i32
  }
  func.func @transform_7(%arg0: i32, %arg1: i32) -> (i32, i32) {
    %c0_i32 = arith.constant 0 : i32
    %c0_i32_0 = arith.constant 0 : i32
    %c0_i32_1 = arith.constant 0 : i32
    return %c0_i32, %c0_i32_0 : i32, i32
  }
  func.func @transform_8(%arg0: i32, %arg1: i32) -> (i32, i32) {
    %c0_i32 = arith.constant 0 : i32
    %c0_i32_0 = arith.constant 0 : i32
    %c0_i32_1 = arith.constant 0 : i32
    return %c0_i32, %c0_i32_0 : i32, i32
  }
  func.func @transform_9(%arg0: i32, %arg1: i32) -> (i32, i32, i32) {
    %c0_i32 = arith.constant 0 : i32
    %c0_i32_0 = arith.constant 0 : i32
    return %arg0, %arg1, %c0_i32 : i32, i32, i32
  }
}

</mosaic_0001>

<bundles_post_ra>
// kernel: attention_layer.1
= control target key start
LH: loop header
LB: loop body
LE: loop exit
PB: predicated region body
PF: predicated region fallthrough
CT: control target
= control target key end

     0   :  { %s2141_s0 = inlined_call_operand.hbm [shape: bf16[2,8,32], index: 0, kind: input, shape index: {}]   ;;  %s2142_s1 = inlined_call_operand.hbm [shape: bf16[2,8,32], index: 1, kind: input, shape index: {}]   ;;  %s2143_s2 = inlined_call_operand.hbm [shape: s8[2,8,8], index: 2, kind: input, shape index: {}]   ;;  %s2144_s3 = inlined_call_operand.hbm [shape: bf16[32,32], index: 3, kind: input, shape index: {}]   ;;  %s2145_s4 = inlined_call_operand.hbm [shape: f32[1,32], index: 4, kind: input, shape index: {}]   ;;  %s2146_s5 = inlined_call_operand.hbm [shape: bf16[32,32], index: 5, kind: input, shape index: {}]   ;;  %s2147_s6 = inlined_call_operand.hbm [shape: f32[1,32], index: 6, kind: input, shape index: {}]   ;;  %s2148_s7 = inlined_call_operand.hbm [shape: bf16[32,32], index: 7, kind: input, shape index: {}]   ;;  %s2149_s8 = inlined_call_operand.hbm [shape: f32[1,32], index: 8, kind: input, shape index: {}]   ;;  %s2150_s9 = inlined_call_operand.hbm [shape: f32[2,8,32], index: 9, kind: output, shape index: {}]  }
   0x1   :  { %2171 = sst [smem:[#allocation32_spill]] %s2142_s1 }
   0x2   :  { %2172 = sst [smem:[#allocation33_spill]] %s2144_s3 }
   0x3   :  { %2173 = sst [smem:[#allocation34_spill]] %s2146_s5 }
   0x4   :  { %2174 = sst [smem:[#allocation35_spill]] %s2148_s7 }
   0x5   :  { %2175 = sst [smem:[#allocation36_spill]] %s2150_s9 }
   0x6   :  { %14 = vsyncpa [#allocation5], 0 }
   0x7   :  { %16 = vsyncpa [#allocation5 + $0x1], 0 }
   0x8   :  { %17 = vsyncpa [#allocation8], 0 }
   0x9   :  { %19 = vsyncpa [#allocation8 + $0x1], 0 }
   0xa   :  { %20 = vsyncpa [#allocation11], 0 }
   0xb   :  { %21 = vsyncpa [#allocation14], 0 }
   0xc   :  { %22 = vsyncpa [#allocation17], 0 }
   0xd   :  { %23 = vsyncpa [#allocation6], 0 }
   0xe   :  { %25 = vsyncpa [#allocation6 + $0x1], 0  ;;  %s1709_s30 = smov 0   ;;  %s1711_s10 = smov 0  }
   0xf   :  { %s1713_s11 = smov 0   ;;  %s1715_s12 = smov 0  }
  0x10   :  { %s1717_s13 = smov 0   ;;  %s1719_s14 = smov 0  }
  0x11 LB: > { %2176 = sst [smem:[#allocation26_spill]] %s1630_s11  ;;  %s1740_s15 = sadd.s32 4294967295, %s1642_s14   ;;  %s1642_s14 = sphi %s1719_s14, %s31_s14   ;;  %s1638_s13 = sphi %s1717_s13, %s2224_s13   ;;  %s1634_s12 = sphi %s1715_s12, %s2223_s12   ;;  %s1630_s11 = sphi %s1713_s11, %s2219_s11   ;;  %s1626_s10 = sphi %s1711_s10, %s2222_s10   ;;  %s1622_s30 = sphi %s1709_s30, %s2221_s30  }
  0x12   : > { %2177 = sst [smem:[#allocation27_spill]] %s1634_s12  ;;  %p1046_p0 = scmp.ge.s32.totalorder %s1642_s14, 1 }
  0x13   : > { %2178 = sst [smem:[#allocation28_spill]] %s1642_s14  ;;  %p2153_p1 = scmp.eq.s32.totalorder %s1740_s15, 0 }
  0x14   : > { %p284_p2 = scmp.lt.s32.totalorder %s1642_s14, 3  ;;  %s1644_s17 = smov [#allocation10]  }
  0x15   : > { %s296_s18 = sshll.u32 %s1644_s17, 4  ;;  %s1645_s20 = smov [#allocation13]   ;;  %s1749_s18 = int_to_ptr.vmem [resolvable:$true] %s296_s18 }
  0x16   : > { %p1745_p3 = pnand %p1046_p0, %p284_p2  ;;  %s320_s21 = sshll.u32 %s1645_s20, 4  ;;  %s1760_s21 = int_to_ptr.vmem [resolvable:$true] %s320_s21 }
  0x17   : > { %s1646_s22 = smov [#allocation16]   ;;  %s2182_s3 = sld [smem:[#allocation33_spill]] }
  0x18   : > { %s2179_s16 = scalar_select %p1745_p3, 1, 0 }
  0x19   : > { %p1170_p4 = pneg %p1745_p3  ;;  %s1762_s23 = sshll.u32 %s1646_s22, 4  ;;  %s345_s23 = int_to_ptr.vmem [resolvable:$true] %s1762_s23 }
  0x1a   : > { %2180 = sst [smem:[#allocation29_spill]] %s2179_s16 }
  0x1b   : > { %p1756_p6 = pnand %p1170_p4, %p2153_p1 }
  0x1d   : > { %s2181_s19 = scalar_select %p1756_p6, 1, 0 }
  0x1e   : > { %s1286_s26 = scalar_lea.hbm %s2182_s3, 256  ;;  %p1772_p8 = pneg %p1756_p6 }
  0x1f   : > { %p1287_p7 = scmp.ne.s32.totalorder %s2182_s3, %s1286_s26  ;;  %p1293_p11 = scmp.lt.u32.totalorder %s1286_s26, %s2182_s3 }
  0x20   : > { %s2183_s29 = scalar_select %p1772_p8, 1, 0 }
  0x21   : > { %p1289_p9 = pnand %p1772_p8, %p1287_p7 }
  0x23   : > { %p1290_p10 = pneg %p1289_p9 }
  0x25   : > { %p1295_p12 = pnand %p1293_p11, %p1290_p10 }
  0x27   : > { %1298 = shalt.err (!%p1295_p12)
}
  0x28   : > { %s1299_s22 = scalar_lea.vmem %s1749_s18, 256  ;;  %p1307_p4 = scmp.lt.s32.totalorder %s1749_s18, %s1749_s18 }
  0x29   : > { %p1300_p13 = scmp.ne.s32.totalorder %s1749_s18, %s1299_s22  ;;  %p1308_p5 = scmp.lt.s32.totalorder %s1299_s22, %s1299_s22 }
  0x2b   : > { %p1302_p0 = pnand %p1300_p13, %p1772_p8  ;;  %p1309_p7 = por %p1308_p5, %p1307_p4 }
  0x2d   : > { %p1303_p2 = pneg %p1302_p0 }
  0x2f   : > { %p1310_p9 = pnand %p1309_p7, %p1303_p2 }
  0x31   : > { %1313 = shalt.err (!%p1310_p9)
}
  0x32   : > { %s1647_s24 = smov 64   ;;  %s1648_s25 = smov 4  }
  0x33   : > { %1173 = dma.hbm_to_vmem [thread:$0]  (!%p1756_p6), %s2182_s3, 256, %s1749_s18, [#allocation11], %s1647_s24, %s1647_s24, %s1648_s25  }
  0x34   : > { %s2184_s5 = sld [smem:[#allocation34_spill]] }
  0x3a   : > { %s1314_s20 = scalar_lea.hbm %s2184_s5, 256 }
  0x3b   : > { %p1315_p5 = scmp.ne.s32.totalorder %s2184_s5, %s1314_s20  ;;  %p1321_p12 = scmp.lt.u32.totalorder %s1314_s20, %s2184_s5 }
  0x3d   : > { %p1317_p10 = pnand %p1315_p5, %p1772_p8 }
  0x3f   : > { %p1318_p11 = pneg %p1317_p10 }
  0x41   : > { %p1323_p13 = pnand %p1321_p12, %p1318_p11 }
  0x43   : > { %1326 = shalt.err (!%p1323_p13)
}
  0x44   : > { %s1327_s18 = scalar_lea.vmem %s1760_s21, 256  ;;  %p1335_p7 = scmp.lt.s32.totalorder %s1760_s21, %s1760_s21 }
  0x45   : > { %p1328_p0 = scmp.ne.s32.totalorder %s1760_s21, %s1327_s18  ;;  %p1336_p9 = scmp.lt.s32.totalorder %s1327_s18, %s1327_s18 }
  0x47   : > { %p1330_p2 = pnand %p1328_p0, %p1772_p8  ;;  %p1337_p5 = por %p1336_p9, %p1335_p7 }
  0x49   : > { %p1331_p4 = pneg %p1330_p2 }
  0x4b   : > { %p1338_p10 = pnand %p1337_p5, %p1331_p4 }
  0x4d   : > { %1341 = shalt.err (!%p1338_p10)
}
  0x4e   : > { %1179 = dma.hbm_to_vmem [thread:$0]  (!%p1756_p6), %s2184_s5, 256, %s1760_s21, [#allocation14], %s1647_s24, %s1647_s24, %s1648_s25  }
  0x4f   : > { %s2185_s7 = sld [smem:[#allocation35_spill]] }
  0x55   : > { %s1342_s27 = scalar_lea.hbm %s2185_s7, 256 }
  0x56   : > { %p1343_p11 = scmp.ne.s32.totalorder %s2185_s7, %s1342_s27  ;;  %p1349_p0 = scmp.lt.u32.totalorder %s1342_s27, %s2185_s7 }
  0x58   : > { %p1345_p12 = pnand %p1343_p11, %p1772_p8 }
  0x5a   : > { %p1346_p13 = pneg %p1345_p12 }
  0x5c   : > { %p1351_p2 = pnand %p1349_p0, %p1346_p13 }
  0x5e   : > { %1354 = shalt.err (!%p1351_p2)
}
  0x5f   : > { %s1355_s18 = scalar_lea.vmem %s345_s23, 256  ;;  %p1363_p5 = scmp.lt.s32.totalorder %s345_s23, %s345_s23 }
  0x60   : > { %p1356_p4 = scmp.ne.s32.totalorder %s345_s23, %s1355_s18  ;;  %p1364_p10 = scmp.lt.s32.totalorder %s1355_s18, %s1355_s18 }
  0x62   : > { %p1358_p7 = pnand %p1356_p4, %p1772_p8  ;;  %p1365_p1 = por %p1364_p10, %p1363_p5 }
  0x64   : > { %p1359_p9 = pneg %p1358_p7 }
  0x66   : > { %p1366_p3 = pnand %p1365_p1, %p1359_p9 }
  0x68   : > { %1369 = shalt.err (!%p1366_p3)
}
  0x69   : > { %1185 = dma.hbm_to_vmem [thread:$0]  (!%p1756_p6), %s2185_s7, 256, %s345_s23, [#allocation17], %s1647_s24, %s1647_s24, %s1648_s25  }
  0x6a   : > { %s1045_s12 = sadd.s32 4294967294, %s1642_s14   ;;  %s43_s16 = sadd.s32 1, %s1638_s13 }
  0x6b   : > { %s52_s26 = sadd.s32 1, %s1630_s11  ;;  %p45_p1 = scmp.ge.s32.totalorder %s43_s16, 2 }
  0x6c   : > { %p59_p3 = scmp.ne.s32.totalorder %s1630_s11, %s1626_s10  ;;  %p60_p11 = scmp.eq.s32.totalorder %s1642_s14, 0 }
  0x6d   : > { %p65_p12 = scmp.ne.s32.totalorder %s1626_s10, %s1622_s30  ;;  %s2226_s16 = smov (%p45_p1, %s43_s16), 0 }
  0x6e   : > { %2186 = sst [smem:[#allocation30_spill]] %s2226_s16  ;;  %p1854_p13 = por %p60_p11, %p59_p3 }
  0x6f   : > { %p2188_p0 = scmp.eq.s32.totalorder %s1740_s15, 0  ;;  %s47_s24 = ssub.s32 %s1638_s13, %s2226_s16 }
  0x70   : > { %p271_p4 = scmp.eq.s32.totalorder %s1740_s15, 1  ;;  %p50_p7 = scmp.eq.s32.totalorder %s47_s24, 0 }
  0x71   : > { %p1860_p2 = por %p2188_p0, %p65_p12  ;;  %p277_p9 = scmp.eq.s32.totalorder %s1045_s12, 1 }
  0x72   : > { %p1867_p5 = por %p271_p4, %p59_p3  ;;  %p1209_p10 = scmp.lt.s32.totalorder %s1642_s14, 2 }
  0x73   : > { %s2189_s23 = scalar_select %p1860_p2, 1, 0 }
  0x74   : > { %s2190_s25 = scalar_select %p1867_p5, 1, 0 }
  0x75   : > { %s1873_s28 = scalar_select %p50_p7, %s1630_s11, %s52_s26  }
  0x76   : > { %p1875_p1 = por %p277_p9, %p65_p12  ;;  %s1880_s20 = sand.u32 1, %s1630_s11  }
  0x77   : > { %2191 = sst [smem:[#allocation31_spill]] %s1873_s28  ;;  %s2156_s22 = sshll.u32 %s1880_s20, 2 }
  0x78   : > { %s2192_s17 = scalar_select %p1875_p1, 1, 0 }
  0x79   : > { %s2157_s18 = sshll.u32 %s1638_s13, 6  ;;  %p1886_p11 = pnand %p1209_p10, %p1854_p13 }
  0x7a   : > { %s388_s9 = sand.u32 1, %s1642_s14   ;;  %s2194_s1 = sld [smem:[#allocation32_spill]] }
  0x7b   : > { %s2193_s21 = scalar_select %p1886_p11, 1, 0 }
  0x7c   : > { %s392_s3 = scalar_lea.vmem [#allocation7], %s2156_s22  ;;  %s1649_s27 = smov [#allocation12]  }
  0x7d   : > { %s399_s5 = sshll.u32 %s392_s3, 4  ;;  %s1902_s7 = sshll.u32 %s1649_s27, 4  ;;  %s1900_s5 = int_to_ptr.vmem [resolvable:$true] %s399_s5  ;;  %s311_s7 = int_to_ptr.vmem [resolvable:$true] %s1902_s7 }
  0x7e   : > { %s1904_s16 = scalar_lea.sflag [#allocation8], %s388_s9  ;;  %p1910_p12 = pneg %p1886_p11 }
  0x80   : > { %s1896_s24 = scalar_lea.hbm %s2194_s1, %s2157_s18  ;;  %s1375_s22 = scalar_lea.hbm %s2194_s1, 128 }
  0x81   : > { %s1370_s28 = scalar_lea.hbm %s1896_s24, 64  ;;  %p1376_p4 = scmp.lt.u32.totalorder %s1896_s24, %s2194_s1 }
  0x82   : > { %p1371_p3 = scmp.ne.s32.totalorder %s1896_s24, %s1370_s28  ;;  %p1377_p7 = scmp.lt.u32.totalorder %s1375_s22, %s1370_s28 }
  0x83   : > { %s2195_s12 = scalar_select %p1910_p12, 1, 0 }
  0x84   : > { %p1373_p13 = pnand %p1910_p12, %p1371_p3  ;;  %p1378_p9 = por %p1377_p7, %p1376_p4 }
  0x85   : > { %p1379_p10 = scmp.lt.u32.totalorder %s1370_s28, %s1896_s24 }
  0x86   : > { %p1374_p0 = pneg %p1373_p13 }
  0x87   : > { %p1380_p1 = por %p1379_p10, %p1378_p9 }
  0x89   : > { %p1381_p5 = pnand %p1380_p1, %p1374_p0 }
  0x8b   : > { %1384 = shalt.err (!%p1381_p5)
}
  0x8c   : > { %s1385_s9 = scalar_lea.vmem %s1900_s5, 64  ;;  %s1650_s26 = smov [#allocation7]  }
  0x8d   : > { %p1386_p3 = scmp.ne.s32.totalorder %s1900_s5, %s1385_s9  ;;  %s1390_s3 = sshll.u32 %s1650_s26, 4  ;;  %s1391_s3 = int_to_ptr.vmem [resolvable:$false] %s1390_s3 }
  0x8e   : > { %s1392_s18 = scalar_lea.vmem %s1391_s3, 128  ;;  %p1393_p6 = scmp.lt.s32.totalorder %s1900_s5, %s1391_s3 }
  0x8f   : > { %p1388_p13 = pnand %p1386_p3, %p1910_p12  ;;  %p1394_p8 = scmp.lt.s32.totalorder %s1392_s18, %s1385_s9 }
  0x91   : > { %p1389_p2 = pneg %p1388_p13  ;;  %p1395_p4 = por %p1394_p8, %p1393_p6 }
  0x93   : > { %p1396_p7 = pnand %p1395_p4, %p1389_p2 }
  0x95   : > { %1399 = shalt.err (!%p1396_p7)
}
  0x96   : > { %1195 = dma.hbm_to_vmem [thread:$0]  (!%p1886_p11), %s1896_s24, 64, %s1900_s5, %s1904_s16  }
  0x97   : > { %s1400_s27 = scalar_lea.hbm %s2145_s4, 16  ;;  %p2196_p6 = scmp.ne.s32.totalorder %s2183_s29, 0 }
  0x98   : > { %p1401_p5 = scmp.ne.s32.totalorder %s2145_s4, %s1400_s27  ;;  %p1407_p1 = scmp.lt.u32.totalorder %s1400_s27, %s2145_s4 }
  0x9a   : > { %p1403_p8 = pnand %p1401_p5, %p2196_p6 }
  0x9c   : > { %p1404_p2 = pneg %p1403_p8 }
  0x9e   : > { %p1409_p0 = pnand %p1407_p1, %p1404_p2 }
  0xa0   : > { %1412 = shalt.err (!%p1409_p0)
}
  0xa1   : > { %s1413_s18 = scalar_lea.vmem %s311_s7, 16  ;;  %s1420_s5 = scalar_lea.vmem %s311_s7, 32 }
  0xa2   : > { %p1414_p9 = scmp.ne.s32.totalorder %s311_s7, %s1413_s18  ;;  %p1421_p13 = scmp.lt.s32.totalorder %s311_s7, %s311_s7 }
  0xa3   : > { %p1422_p4 = scmp.lt.s32.totalorder %s1420_s5, %s1413_s18 }
  0xa4   : > { %p1416_p10 = pnand %p1414_p9, %p2196_p6 }
  0xa5   : > { %p1423_p7 = por %p1422_p4, %p1421_p13 }
  0xa6   : > { %p1417_p3 = pneg %p1416_p10 }
  0xa8   : > { %p1424_p11 = pnand %p1423_p7, %p1417_p3 }
  0xaa   : > { %1427 = shalt.err (!%p1424_p11)
}
  0xab   : > { %p2197_p5 = scmp.ne.s32.totalorder %s2181_s19, 0  ;;  %s1651_s28 = smov [#allocation15]  }
  0xac   : > { %s334_s22 = sshll.u32 %s1651_s28, 4  ;;  %s1652_s27 = smov [#allocation18]   ;;  %s335_s22 = int_to_ptr.vmem [resolvable:$true] %s334_s22 }
  0xad   : > { %1176 = dma.hbm_to_vmem [thread:$0]  (!%p2197_p5), %s2145_s4, 16, %s311_s7, [#allocation11]  }
  0xae   : > { %s358_s26 = sshll.u32 %s1652_s27, 4  ;;  %s1428_s11 = scalar_lea.hbm %s2147_s6, 16  ;;  %s359_s26 = int_to_ptr.vmem [resolvable:$true] %s358_s26 }
  0xaf   : > { %p1429_p11 = scmp.ne.s32.totalorder %s2147_s6, %s1428_s11  ;;  %p1435_p1 = scmp.lt.u32.totalorder %s1428_s11, %s2147_s6 }
  0xb1   : > { %p1431_p8 = pnand %p1429_p11, %p2196_p6 }
  0xb3   : > { %p1432_p2 = pneg %p1431_p8 }
  0xb5   : > { %p1437_p0 = pnand %p1435_p1, %p1432_p2 }
  0xb7   : > { %1440 = shalt.err (!%p1437_p0)
}
  0xb8   : > { %s1441_s7 = scalar_lea.vmem %s335_s22, 16  ;;  %s1448_s24 = scalar_lea.vmem %s335_s22, 32 }
  0xb9   : > { %p1442_p9 = scmp.ne.s32.totalorder %s335_s22, %s1441_s7  ;;  %p1449_p13 = scmp.lt.s32.totalorder %s335_s22, %s335_s22 }
  0xba   : > { %p1450_p4 = scmp.lt.s32.totalorder %s1448_s24, %s1441_s7 }
  0xbb   : > { %p1444_p10 = pnand %p1442_p9, %p2196_p6 }
  0xbc   : > { %p1451_p7 = por %p1450_p4, %p1449_p13 }
  0xbd   : > { %p1445_p3 = pneg %p1444_p10 }
  0xbf   : > { %p1452_p12 = pnand %p1451_p7, %p1445_p3 }
  0xc1   : > { %1455 = shalt.err (!%p1452_p12)
}
  0xc2   : > { %1182 = dma.hbm_to_vmem [thread:$0]  (!%p2197_p5), %s2147_s6, 16, %s335_s22, [#allocation14]  }
  0xc3   : > { %s1456_s9 = scalar_lea.hbm %s2149_s8, 16 }
  0xc4   : > { %p1457_p11 = scmp.ne.s32.totalorder %s2149_s8, %s1456_s9  ;;  %p1463_p12 = scmp.lt.u32.totalorder %s1456_s9, %s2149_s8 }
  0xc6   : > { %p1459_p8 = pnand %p1457_p11, %p2196_p6 }
  0xc8   : > { %p1460_p2 = pneg %p1459_p8 }
  0xca   : > { %p1465_p1 = pnand %p1463_p12, %p1460_p2 }
  0xcc   : > { %1468 = shalt.err (!%p1465_p1)
}
  0xcd   : > { %s1469_s7 = scalar_lea.vmem %s359_s26, 16  ;;  %s1476_s22 = scalar_lea.vmem %s359_s26, 32 }
  0xce   : > { %p1470_p0 = scmp.ne.s32.totalorder %s359_s26, %s1469_s7  ;;  %p1477_p3 = scmp.lt.s32.totalorder %s359_s26, %s359_s26 }
  0xcf   : > { %p1478_p13 = scmp.lt.s32.totalorder %s1476_s22, %s1469_s7 }
  0xd0   : > { %p1472_p9 = pnand %p1470_p0, %p2196_p6 }
  0xd1   : > { %p1479_p4 = por %p1478_p13, %p1477_p3 }
  0xd2   : > { %p1473_p10 = pneg %p1472_p9 }
  0xd4   : > { %p1480_p7 = pnand %p1479_p4, %p1473_p10 }
  0xd6   : > { %1483 = shalt.err (!%p1480_p7)
}
  0xd7   : > { %1188 = dma.hbm_to_vmem [thread:$0]  (!%p2197_p5), %s2149_s8, 16, %s359_s26, [#allocation17]  }
  0xd8   : > { %s2198_s29 = sshll.u32 %s1638_s13, 6  ;;  %s2199_s9 = sshll.u32 %s1880_s20, 2 }
  0xd9   : > { %s1994_s14 = scalar_lea.hbm %s2141_s0, %s2198_s29  ;;  %s373_s19 = scalar_lea.vmem [#allocation4], %s2199_s9 }
  0xda   : > { %s381_s3 = sshll.u32 %s373_s19, 4  ;;  %s1058_s18 = sshll.u32 %s1880_s20, 1  ;;  %s382_s3 = int_to_ptr.vmem [resolvable:$true] %s381_s3 }
  0xdb   : > { %s370_s5 = scalar_lea.sflag [#allocation5], %s1880_s20  ;;  %s1484_s1 = scalar_lea.hbm %s1994_s14, 64 }
  0xdc   : > { %p1485_p6 = scmp.ne.s32.totalorder %s1994_s14, %s1484_s1  ;;  %p2200_p11 = scmp.ne.s32.totalorder %s2195_s12, 0 }
  0xdd   : > { %s1489_s22 = scalar_lea.hbm %s2141_s0, 128  ;;  %p1490_p2 = scmp.lt.u32.totalorder %s1994_s14, %s2141_s0 }
  0xde   : > { %p1487_p5 = pnand %p1485_p6, %p2200_p11  ;;  %p1491_p12 = scmp.lt.u32.totalorder %s1489_s22, %s1484_s1 }
  0xdf   : > { %p1493_p0 = scmp.lt.u32.totalorder %s1484_s1, %s1994_s14 }
  0xe0   : > { %p1488_p8 = pneg %p1487_p5  ;;  %p1492_p1 = por %p1491_p12, %p1490_p2 }
  0xe2   : > { %p1494_p9 = por %p1493_p0, %p1492_p1 }
  0xe4   : > { %p1495_p10 = pnand %p1494_p9, %p1488_p8 }
  0xe6   : > { %1498 = shalt.err (!%p1495_p10)
}
  0xe7   : > { %s1499_s29 = scalar_lea.vmem %s382_s3, 64  ;;  %s1653_s27 = smov [#allocation4]  }
  0xe8   : > { %p1500_p3 = scmp.ne.s32.totalorder %s382_s3, %s1499_s29  ;;  %s1504_s11 = sshll.u32 %s1653_s27, 4  ;;  %s1505_s11 = int_to_ptr.vmem [resolvable:$false] %s1504_s11 }
  0xe9   : > { %s1506_s9 = scalar_lea.vmem %s1505_s11, 128  ;;  %p1507_p7 = scmp.lt.s32.totalorder %s382_s3, %s1505_s11 }
  0xea   : > { %p1502_p13 = pnand %p1500_p3, %p2200_p11  ;;  %p1508_p6 = scmp.lt.s32.totalorder %s1506_s9, %s1499_s29 }
  0xec   : > { %p1503_p4 = pneg %p1502_p13  ;;  %p1509_p5 = por %p1508_p6, %p1507_p7 }
  0xee   : > { %p1510_p2 = pnand %p1509_p5, %p1503_p4 }
  0xf0   : > { %1513 = shalt.err (!%p1510_p2)
}
  0xf1   : > { %p2201_p12 = scmp.ne.s32.totalorder %s2193_s21, 0  ;;  %s1059_s19 = sshll.u32 %s1638_s13, 5 }
  0xf2   : > { %s410_s1 = scalar_lea.vmem [#allocation9], %s1058_s18  ;;  %s416_s24 = scalar_lea.hbm %s2143_s2, %s1059_s19 }
  0xf3   : > { %1192 = dma.hbm_to_vmem [thread:$0]  (!%p2201_p12), %s1994_s14, 64, %s382_s3, %s370_s5  }
  0xf4   : > { %s418_s26 = sshll.u32 %s410_s1, 4  ;;  %s1514_s28 = scalar_lea.hbm %s416_s24, 32  ;;  %s419_s26 = int_to_ptr.vmem [resolvable:$true] %s418_s26 }
  0xf5   : > { %p1515_p8 = scmp.ne.s32.totalorder %s416_s24, %s1514_s28  ;;  %s1519_s11 = scalar_lea.hbm %s2143_s2, 64 }
  0xf6   : > { %p1520_p9 = scmp.lt.u32.totalorder %s416_s24, %s2143_s2  ;;  %p1521_p10 = scmp.lt.u32.totalorder %s1519_s11, %s1514_s28 }
  0xf7   : > { %p1517_p1 = pnand %p1515_p8, %p2200_p11  ;;  %p1523_p13 = scmp.lt.u32.totalorder %s1514_s28, %s416_s24 }
  0xf8   : > { %p1522_p3 = por %p1521_p10, %p1520_p9 }
  0xf9   : > { %p1518_p0 = pneg %p1517_p1 }
  0xfa   : > { %p1524_p4 = por %p1523_p13, %p1522_p3 }
  0xfc   : > { %p1525_p7 = pnand %p1524_p4, %p1518_p0 }
  0xfe   : > { %1528 = shalt.err (!%p1525_p7)
}
  0xff   : > { %s1529_s20 = scalar_lea.vmem %s419_s26, 32  ;;  %s1654_s3 = smov [#allocation9]  }
 0x100   : > { %p1530_p6 = scmp.ne.s32.totalorder %s419_s26, %s1529_s20  ;;  %s1534_s18 = sshll.u32 %s1654_s3, 4  ;;  %s1535_s18 = int_to_ptr.vmem [resolvable:$false] %s1534_s18 }
 0x101   : > { %s1536_s5 = scalar_lea.vmem %s1535_s18, 64  ;;  %p1537_p8 = scmp.lt.s32.totalorder %s419_s26, %s1535_s18 }
 0x102   : > { %p1532_p5 = pnand %p1530_p6, %p2200_p11  ;;  %p1538_p1 = scmp.lt.s32.totalorder %s1536_s5, %s1529_s20 }
 0x104   : > { %p1533_p2 = pneg %p1532_p5  ;;  %p1539_p12 = por %p1538_p1, %p1537_p8 }
 0x106   : > { %p1540_p9 = pnand %p1539_p12, %p1533_p2 }
 0x108   : > { %1543 = shalt.err (!%p1540_p9)
}
 0x109   : > { %p2202_p10 = scmp.ne.s32.totalorder %s2193_s21, 0  ;;  %s2203_s19 = sld [smem:[#allocation29_spill]] }
 0x10b   : > { %1198 = dma.hbm_to_vmem [thread:$0]  (!%p2202_p10), %s416_s24, 32, %s419_s26, %s1904_s16  }
 0x10f   : > { %p2204_p0 = scmp.ne.s32.totalorder %s2203_s19, 0 }
 0x110   : > { %s2039_s12 = sand.u32 (!%p2204_p0), 1, %s1626_s10   ;;  %p2205_p11 = scmp.ne.s32.totalorder (!%p2204_p0), %s2189_s23, 0 }
 0x111   : > { %427 = sbr.rel (%p2204_p0) target bundleno = 1137 (0x471), region = 56  ;;  %s1061_s1 = sshll.u32 (!%p2204_p0), %s2039_s12, 2 }
 0x112   : > { %s430_s7 = scalar_lea.sflag (!%p2204_p0), [#allocation5], %s2039_s12  ;;  %s2043_s22 = scalar_lea.vmem (!%p2204_p0), [#allocation4], %s1061_s1 }
 0x118   : > { %1597 = dma.done.wait (%p2205_p11), %s430_s7, 64  }
 0x119   : > { %1599 = vsyncadd (%p2205_p11), %s430_s7, 4294967232  ;;  %s438_s16 = sand.u32 1, %s1740_s15   ;;  %s442_s26 = scalar_lea.vmem [#allocation7], %s1061_s1 }
 0x11a   : > { %s439_s21 = scalar_lea.sflag [#allocation8], %s438_s16 }
 0x11b   : > { %1601 = dma.done.wait (%p2205_p11), %s439_s21, 96  }
 0x11c   : > { %1603 = vsyncadd (%p2205_p11), %s439_s21, 4294967200  ;;  %s1063_s24 = sshll.u32 %s2039_s12, 1  ;;  %p2206_p12 = scmp.eq.s32.totalorder %s1740_s15, 0 }
 0x11d   : > { %s2055_s28 = scalar_lea.vmem [#allocation9], %s1063_s24 }
 0x11e   : > { %1605 = dma.done.wait (%p2206_p12), [#allocation11], 272   ;;  %p2207_p3 = pmov %p2206_p12 }
 0x120   : > { %1607 = vsyncadd (%p2207_p3), [#allocation11], 4294967024  ;;  %p2208_p13 = pmov %p2207_p3 }
 0x121   : > { %p2209_p4 = pmov %p2207_p3 }
 0x122   : > { %1609 = dma.done.wait (%p2208_p13), [#allocation14], 272  }
 0x123   : > { %1611 = vsyncadd (%p2209_p4), [#allocation14], 4294967024  ;;  %p2210_p7 = pmov %p2207_p3 }
 0x124   : > { %p2211_p6 = pmov %p2207_p3 }
 0x125   : > { %1613 = dma.done.wait (%p2210_p7), [#allocation17], 272  }
 0x126   : > { %1615 = vsyncadd (%p2211_p6), [#allocation17], 4294967024  ;;  %v1655_v0 = vmov 0.0   ;;  %vm1656_vm0 = vmmov 0   ;;  %v1276_v1 = vld [vmem:[#allocation13] sm:$0xff]   ;;  %v1277_v2 = vld [vmem:[#allocation13 + $0x8] sm:$0xff]  }
 0x127   : > { %1102 = vmatprep.subr.bf16.mxu0 %v1655_v0  ;;  %1106 = vmatprep.mubr.msk.bf16.mxu0 %vm1656_vm0, %v1655_v0  ;;  %v527_v3 = vld [vmem:[%s442_s26] sm:$0xf]  ;;  %vm551_vm1 = vcmask 261120   ;;  %v1278_v4 = vld [vmem:[#allocation10] sm:$0xff]   ;;  %v1279_v5 = vld [vmem:[#allocation10 + $0x8] sm:$0xff]   ;;  %vm659_vm2 = vcmask 257024  }
 0x128   : > { %1110 = vmatprep.subr.bf16.mxu1 %v1655_v0  ;;  %1114 = vmatprep.mubr.msk.bf16.mxu1 %vm1656_vm0, %v1655_v0  ;;  %v663_v6 = vld [vmem:[%s2043_s22] sm:$0xf]  ;;  %v1280_v7 = vld [vmem:[#allocation16] sm:$0xff]   ;;  %v1071_v9 = vld [vmem:[#allocation15] ss:$0 sm:$0xff]  ;;  %vm801_vm3 = vcmask 1043456  }
 0x129   : > { %1103 = vmatpush3.bf16.msra.mxu0 %v1276_v1  ;;  %1111 = vmatpush3.bf16.msra.mxu1 %v1280_v7  ;;  %v1281_v8 = vld [vmem:[#allocation16 + $0x8] sm:$0xff]   ;;  %v1075_v26 = vld [vmem:[#allocation18] ss:$0 sm:$0xff]  ;;  %v780_v35 = vld [vmem:[%s2055_s28] sm:$0x3]  ;;  %v1657_v36 = vmov 0  }
 0x12a   : > { %1104 = vmatprep.subr.bf16.mxu0 %v1655_v0  ;;  %1112 = vmatprep.subr.bf16.mxu1 %v1655_v0  ;;  %v1079_v16 = vld [vmem:[#allocation12] ss:$0 sm:$0xff]  ;;  %vm781_vm4 = vnez %v780_v35  ;;  %vm786_vm6 = vcmask 64512   ;;  %s2212_s15 = sld [smem:[#allocation27_spill]]  ;;  %s1070_s23 = sshll.u32 %s2039_s12, 3 }
 0x12b   : > { %v782_v37 = vsel %vm781_vm4, 16843009, %v1657_v36  ;;  %s519_s27 = scalar_lea.vmem [#allocation19], %s1070_s23  ;;  %s2213_s20 = sld [smem:[#allocation36_spill]] }
 0x12c   : > { %v783_v38 = vunpack.c.0.s8 %v782_v37  ;;  %s863_s11 = sshll.u32 %s519_s27, 4  ;;  %s849_s18 = scalar_lea.sflag [#allocation6], %s2039_s12  ;;  %s2093_s11 = int_to_ptr.vmem [resolvable:$true] %s863_s11 }
 0x12d   : > { %1105 = vmatpush3.bf16.msra.mxu0 %v1277_v2  ;;  %1113 = vmatpush3.bf16.msra.mxu1 %v1281_v8  ;;  %s1544_s5 = scalar_lea.vmem %s2093_s11, 128  ;;  %p2214_p2 = scmp.ne.s32.totalorder %s2190_s25, 0 }
 0x12e   : > { %1118 = vmatprep.subr.bf16.mxu0 %v1655_v0  ;;  %1126 = vmatprep.subr.bf16.mxu1 %v1655_v0  ;;  %vm784_vm5 = vcmp.ne.s32.totalorder %v783_v38, 0  ;;  %p1545_p5 = scmp.ne.s32.totalorder %s2093_s11, %s1544_s5  ;;  %s1658_s19 = smov [#allocation19]  }
 0x12f   : > { %s1548_s1 = sshll.u32 %s1658_s19, 4  ;;  %s1549_s1 = int_to_ptr.vmem [resolvable:$false] %s1548_s1 }
 0x130   : > { %1107 = vmatmul.mubr.msk.bf16.vlgmr.msra.gmra.mrb[0].mxu0 %vm551_vm1, %v527_v3  ;;  %1115 = vmatmul.mubr.msk.bf16.vlgmr.msra.gmra.mrb[0].mxu1 %vm551_vm1, %v527_v3  ;;  %s1086_s29 = sshll.u32 %s2212_s15, 7  ;;  %p1546_p8 = pnand %p1545_p5, %p2214_p2 }
 0x131   : > { %1119 = vmatpush3.bf16.msra.mxu0 %v1278_v4  ;;  %1122 = vmatprep.mubr.msk.bf16.mxu0 %vm1656_vm0, %v1655_v0  ;;  %s2091_s3 = scalar_lea.hbm %s2213_s20, %s1086_s29  ;;  %s1550_s7 = scalar_lea.vmem %s1549_s1, 256 }
 0x132   : > { %1120 = vmatprep.subr.bf16.mxu0 %v1655_v0  ;;  %1128 = vmatprep.mubr.msk.bf16.mxu1 %vm1656_vm0, %v1655_v0  ;;  %p1547_p1 = pneg %p1546_p8  ;;  %p1551_p9 = scmp.lt.s32.totalorder %s2093_s11, %s1549_s1 }
 0x133   : > { %p1552_p10 = scmp.lt.s32.totalorder %s1550_s7, %s1544_s5 }
 0x135   : > { %1121 = vmatpush3.bf16.msra.mxu0 %v1279_v5  ;;  %p1553_p0 = por %p1552_p10, %p1551_p9 }
 0x136   : > { %1132 = vmatprep.subr.bf16.mxu0 %v1655_v0 }
 0x137   : > { %p1554_p11 = pnand %p1553_p0, %p1547_p1 }
 0x138   : > { %1123 = vmatmul.mubr.msk.bf16.vlgmr.msra.gmra.mrb[4].mxu0 %vm551_vm1, %v663_v6 }
 0x139   : > { %1134 = vmatprep.mubr.msk.bf16.mxu0 %vm1656_vm0, %v1655_v0 }
 0x203   : > { %v589_v10 = vpop.f32.mrb[0].mxu0  ;;  %v652_v27 = vpop.f32.mrb[0].mxu1 }
 0x204   : > { %v590_v11 = vadd.f32 %v1071_v9, %v589_v10  ;;  %v1108_v12 = vpop.f32.mrb[1].mxu0  ;;  %v653_v28 = vadd.f32 %v1075_v26, %v652_v27  ;;  %v1116_v29 = vpop.f32.mrb[1].mxu1 }
 0x205   : > { %v592_v13 = vpop.f32.mrb[2].mxu0  ;;  %v655_v30 = vpop.f32.mrb[2].mxu1 }
 0x206   : > { %v658_v14 = vpack.c.bf16 %v590_v11, %v590_v11  ;;  %v1109_v15 = vpop.f32.mrb[3].mxu0  ;;  %v661_v31 = vpack.c.bf16 %v653_v28, %v653_v28  ;;  %v1117_v32 = vpop.f32.mrb[3].mxu1 }
 0x208   : > { %660 = vst.msk [vmem:[#allocation2] sm:$0xf] %vm659_vm2, %v658_v14  ;;  %662 = vst.msk [vmem:[#allocation3] sm:$0xf] %vm659_vm2, %v661_v31 }
 0x20b   : > { %v725_v17 = vpop.f32.mrb[4].mxu0 }
 0x20c   : > { %v726_v18 = vadd.f32 %v1079_v16, %v725_v17  ;;  %v1124_v19 = vpop.f32.mrb[5].mxu0 }
 0x20d   : > { %v728_v20 = vpop.f32.mrb[6].mxu0 }
 0x20e   : > { %v1125_v21 = vpop.f32.mrb[7].mxu0  ;;  %v731_v23 = vmul.f32 0.17677669, %v726_v18 }
 0x20f   : > { %v733_v22 = vld [vmem:[#allocation2] sm:$0xf]  ;;  %v797_v33 = vld [vmem:[#allocation3] sm:$0xf] }
 0x210   : > { %v738_v24 = vsel %vm551_vm1, %v733_v22, 0  ;;  %v732_v25 = vpack.c.bf16 %v731_v23, %v731_v23  ;;  %v803_v34 = vsel %vm801_vm3, %v797_v33, 0 }
 0x211   : > { %1127 = vmatpush3.bf16.xpose.msra.mxu1 %v738_v24  ;;  %1133 = vmatpush3.bf16.msra.mxu0 %v803_v34 }
 0x218   : > { %1129 = vmatmul.mubr.msk.bf16.vlgmr.msra.gmra.mrb[4].mxu1 %vm551_vm1, %v732_v25 }
 0x2eb   : > { %v774_v39 = vpop.f32.mrb[4].mxu1 }
 0x2ec   : > { %v785_v40 = vsel %vm784_vm5, -1e+30, %v774_v39  ;;  %v1130_v41 = vpop.f32.mrb[5].mxu1 }
 0x2ed   : > { %v777_v42 = vpop.f32.mrb[6].mxu1  ;;  %v787_v43 = vsel %vm786_vm6, %v785_v40, -inf }
 0x2ee   : > { %788 = vmax.xlane.f32.xlu0 %v787_v43  ;;  %v1131_v44 = vpop.f32.mrb[7].mxu1 }
 0x37b   : > { %v789_v45 = vpop.xlane.xlu0 %788 }
 0x37c   : > { %v790_v46 = vsub.f32 %v785_v40, %v789_v45 }
 0x37e   : > { %v791_v47 = vmul.f32 1.442695, %v790_v46 }
 0x380   : > { %1282 = vpow2.f32 %v791_v47 }
 0x38a   : > { %v1283_v48 = vpop.eup %1282 }
 0x38b   : > { %v793_v49 = vsel %vm786_vm6, %v1283_v48, 0.0  ;;  %v796_v50 = vpack.c.bf16 %v1283_v48, %v1283_v48 }
 0x38c   : > { %794 = vadd.xlane.f32.xlu0 %v793_v49 }
 0x38d   : > { %1135 = vmatmul.mubr.msk.bf16.vlgmr.msra.gmra.mrb[8].mxu0 %vm786_vm6, %v796_v50 }
 0x419   : > { %v795_v51 = vpop.xlane.xlu0 %794 }
 0x41a   : > { %1284 = vrcp.f32 %v795_v51 }
 0x424   : > { %v1285_v52 = vpop.eup %1284 }
 0x460   : > { %v839_v53 = vpop.f32.mrb[8].mxu0 }
 0x461   : > { %v846_v54 = vmul.f32 %v1285_v52, %v839_v53  ;;  %v1136_v55 = vpop.f32.mrb[9].mxu0 }
 0x462   : > { %v842_v56 = vpop.f32.mrb[10].mxu0 }
 0x463   : > { %v1137_v57 = vpop.f32.mrb[11].mxu0  ;;  %847 = vst.msk [vmem:[%s519_s27] sm:$0xff] %vm551_vm1, %v846_v54 }
 0x464   : > { %1557 = shalt.err (!%p1554_p11)
}
 0x465   : > { %s1558_s12 = scalar_lea.hbm %s2091_s3, 128  ;;  %s1562_s21 = scalar_lea.hbm %s2213_s20, 256 }
 0x466   : > { %p1559_p12 = scmp.ne.s32.totalorder %s2091_s3, %s1558_s12  ;;  %p1563_p4 = scmp.lt.u32.totalorder %s2091_s3, %s2213_s20 }
 0x467   : > { %p1564_p7 = scmp.lt.u32.totalorder %s1562_s21, %s1558_s12  ;;  %p1566_p5 = scmp.lt.u32.totalorder %s1558_s12, %s2091_s3 }
 0x468   : > { %p1560_p3 = pnand %p1559_p12, %p2214_p2 }
 0x469   : > { %p1565_p6 = por %p1564_p7, %p1563_p4 }
 0x46a   : > { %p1561_p13 = pneg %p1560_p3 }
 0x46b   : > { %p1567_p8 = por %p1566_p5, %p1565_p6 }
 0x46d   : > { %p1568_p1 = pnand %p1567_p8, %p1561_p13 }
 0x46f   : > { %1571 = shalt.err (!%p1568_p1)
}
 0x470   : > { %1168 = dma.vmem_to_hbm [thread:$0]  (%p2214_p2), %s2093_s11, 128, %s2091_s3, %s849_s18  }
 0x471 PF: > { %s2215_s28 = sld [smem:[#allocation28_spill]]  ;;  %s875_s15 = sand.u32 1, %s1622_s30  }
 0x472   : > { %p2216_p9 = scmp.ne.s32.totalorder %s2192_s17, 0  ;;  %s876_s23 = scalar_lea.sflag [#allocation6], %s875_s15 }
 0x477   : > { %p2217_p10 = scmp.ge.s32.totalorder %s2215_s28, 2 }
 0x479   : > { %p1200_p0 = pnand %p2217_p10, %p2216_p9 }
 0x47b   : > { %1617 = dma.done.wait (!%p1200_p0), %s876_s23, 128  }
 0x47c   : > { %1619 = vsyncadd (!%p1200_p0), %s876_s23, 4294967168  ;;  %s31_s14 = sadd.s32 1, %s2215_s28   ;;  %s2218_s29 = sld [smem:[#allocation26_spill]] }
 0x47d   : > { %p28_p11 = scmp.ge.s32.totalorder %s31_s14, 4   ;;  %s2219_s11 = sld [smem:[#allocation31_spill]] }
 0x47e   : > { %s2220_s25 = sld [smem:[#allocation30_spill]]  ;;  %s2221_s30 = smov %s1626_s10 }
 0x47f   : > { %s2223_s12 = smov %s1638_s13  ;;  %30 = sbr.rel (!%p28_p11) target bundleno = 17 (0x11), region = 153 }
 0x482   : > { %s2222_s10 = smov %s2218_s29 }
 0x484   : > { %s2224_s13 = smov %s2220_s25 }
 0x486   :  { %881 = vsyncpa [#allocation5], 1 }
 0x487   :  { %883 = vsyncpa [#allocation5 + $0x1], 1 }
 0x488   :  { %884 = vsyncpa [#allocation8], 1 }
 0x489   :  { %886 = vsyncpa [#allocation8 + $0x1], 1 }
 0x48a   :  { %887 = vsyncpa [#allocation11], 1 }
 0x48b   :  { %888 = vsyncpa [#allocation14], 1 }
 0x48c   :  { %889 = vsyncpa [#allocation17], 1 }
 0x48d   :  { %890 = vsyncpa [#allocation6], 1 }
 0x48e   :  { %892 = vsyncpa [#allocation6 + $0x1], 1 }

</bundles_post_ra>
